<compile_context>
chip_gen: v6e
topology: v6e:2x2x1
jax: 0.10.0
libtpu: 0.0.40
codegen_flags: <defaults>
</compile_context>

<pallas_src>
import functools

import jax
import jax.numpy as jnp
from jax.experimental import pallas as pl
from jax.experimental.pallas import tpu as pltpu

_LANE = 128
_TILE_BUDGET = 8 * 1024 * 1024          # target bytes per (native-dtype) input tile
_VMEM_LIMIT = 48 * 1024 * 1024          # explicit scoped-VMEM limit (< v7x 64 MiB)


def _round_up(v, m):
    return ((v + m - 1) // m) * m


def _sum_hw_chunks(load_f32, thw, valid):
    """Sum a (TN, C, thw) tile over its last axis with 128-wide chunked adds.

    load_f32(start, size) returns an f32 (TN, C, size) chunk (native-dtype
    load + per-chunk upcast, so no full-tile f32 temp).  `thw` and `valid`
    are Python ints; only the first `valid` lanes contribute.
    """
    n_full = valid // _LANE
    rem = valid % _LANE
    partial = None
    tail = None
    for ci in range(n_full):
        chunk = load_f32(ci * _LANE, _LANE)
        partial = chunk if partial is None else partial + chunk
    if rem:
        start = n_full * _LANE
        size = min(_LANE, thw - start)
        chunk = load_f32(start, size)
        if rem < size:  # chunk straddles the valid/padded boundary -> mask it
            lane = jax.lax.broadcasted_iota(jnp.int32, chunk.shape, 2)
            chunk = jnp.where(lane < rem, chunk, 0.0)
        if size == _LANE and partial is not None:
            partial = partial + chunk
        else:
            tail = jnp.sum(chunk, axis=2)
    out = None if partial is None else jnp.sum(partial, axis=2)
    if tail is not None:
        out = tail if out is None else out + tail
    return out


def _condition_head_kernel(x_ref, w_ref, b_ref, o_ref, acc_ref, *, hw_total, thw):
    """One (batch-tile, HW-tile) grid step.

    x_ref:   (TN, C, THW) input tile, native dtype
    w_ref:   (C, K)  f32 weight, pre-scaled by 1/(H*W)
    b_ref:   (1, K)  f32 bias
    o_ref:   (TN, K) output tile (written only on the last HW step)
    acc_ref: (TN, C) f32 running spatial sum (resident across the HW axis)
    """
    k = pl.program_id(1)

    @pl.when(k == 0)
    def _init():
        acc_ref[...] = jnp.zeros_like(acc_ref)

    def load_f32(start, size):
        return x_ref[:, :, start:start + size].astype(jnp.float32)

    n_k = (hw_total + thw - 1) // thw            # static
    last_valid = hw_total - (n_k - 1) * thw      # static, in [1, thw]

    if last_valid == thw:
        # Every HW step is fully valid: no masking anywhere.
        acc_ref[...] += _sum_hw_chunks(load_f32, thw, thw)
    else:
        # Mask only on the final HW step (and only the straddling chunk).
        @pl.when(k < n_k - 1)
        def _full_steps():
            acc_ref[...] += _sum_hw_chunks(load_f32, thw, thw)

        @pl.when(k == n_k - 1)
        def _last_step():
            acc_ref[...] += _sum_hw_chunks(load_f32, thw, last_valid)

    @pl.when(k == n_k - 1)
    def _finalize():
        pooled = acc_ref[...]                               # raw f32 sum over H*W
        out = jnp.dot(pooled, w_ref[...],                   # weight carries 1/(H*W)
                      preferred_element_type=jnp.float32)
        o_ref[...] = (out + b_ref[...]).astype(o_ref.dtype)


def _choose_tiles(n, c, hw, itemsize, budget=_TILE_BUDGET):
    """Pick (TN, THW).

    Prefer contiguous full-HW tiles and shrink TN (multiples of 8) to fit the
    budget; only tile HW when one sample's (C, HW) slab alone exceeds it.
    With N >= 16, guarantee >= 2 batch tiles so both v7x TensorCores are used.
    """
    bytes_per_sample = c * hw * itemsize
    if bytes_per_sample <= budget:
        tn_fit = max(1, budget // bytes_per_sample)
        if n <= tn_fit:
            tn = n
        else:
            tn = max(8, (tn_fit // 8) * 8)
        if tn >= n and n >= 16:
            # Split the parallel axis so megacore gets >= 2 programs.
            tn = max(8, _round_up(n // 2, 8))
            if tn >= n:
                tn = max(8, tn - 8)
        thw = hw
    else:
        # Single sample exceeds the budget: lane-aligned HW tiling.
        tn = n if n < 8 else 8
        per_row = max(1, tn * c * itemsize)
        thw = max(_LANE, (budget // per_row) // _LANE * _LANE)
        thw = min(thw, max(_LANE, (hw // _LANE) * _LANE))
        if thw >= hw:
            thw = hw
    return tn, thw


def condition_head(x_nchw, weight, bias, *, thw=None):
    """Equivalent of ConditionHead.forward: x.mean([2, 3]) @ weight.T + bias.

    x_nchw: (N, C, H, W) in its native dtype (bf16 or f32 -- no wrapper upcast)
    weight: (K, C) torch-style nn.Linear weight
    bias:   (K,)
    thw:    optional spatial tile override (must be a multiple of 128 or >= H*W)
    """
    N, C, H, W = x_nchw.shape
    K = weight.shape[0]
    HW = H * W

    x_flat = x_nchw.reshape(N, C, HW)              # contiguous -> free reshape
    inv_hw = 1.0 / float(HW)
    w_ck = weight.T.astype(jnp.float32) * inv_hw   # fold mean scale into W
    b_1k = bias.reshape(1, K).astype(jnp.float32)

    TN, THW = _choose_tiles(N, C, HW, x_flat.dtype.itemsize)
    if thw is not None:
        THW = min(int(thw), HW)
        if THW != HW and THW % _LANE != 0:
            raise ValueError(
                f"thw={thw} must be >= H*W ({HW}) or a multiple of {_LANE}")
    grid = (pl.cdiv(N, TN), pl.cdiv(HW, THW))

    kernel = functools.partial(_condition_head_kernel, hw_total=HW, thw=THW)

    in_itemsize = x_flat.dtype.itemsize
    cost = pl.CostEstimate(
        flops=N * C * HW + 2 * N * C * K + N * K,
        transcendentals=0,
        bytes_accessed=(N * C * HW * in_itemsize + C * K * 4 + K * 4
                        + N * K * x_nchw.dtype.itemsize),
    )

    return pl.pallas_call(
        kernel,
        out_shape=jax.ShapeDtypeStruct((N, K), x_nchw.dtype),
        grid_spec=pltpu.PrefetchScalarGridSpec(
            num_scalar_prefetch=0,
            grid=grid,
            in_specs=[
                pl.BlockSpec((TN, C, THW), lambda n, k: (n, 0, k)),
                pl.BlockSpec((C, K), lambda n, k: (0, 0)),   # stays resident
                pl.BlockSpec((1, K), lambda n, k: (0, 0)),   # stays resident
            ],
            out_specs=pl.BlockSpec((TN, K), lambda n, k: (n, 0)),
            scratch_shapes=[pltpu.VMEM((TN, C), jnp.float32)],
        ),
        compiler_params=pltpu.CompilerParams(
            dimension_semantics=("parallel", "arbitrary"),
            vmem_limit_bytes=_VMEM_LIMIT,
        ),
        cost_estimate=cost,
    )(x_flat, w_ck, b_1k)


if __name__ == "__main__":
    # Shapes consistent with the module: backbone_out (channels) = 32,
    # n_condition_classes = 8.
    n_condition_classes = 8
    C = 32

    key = jax.random.PRNGKey(0)
    kx, kw, kb, kx2, kx3 = jax.random.split(key, 5)

    # torch.nn.Linear-style init: U(-1/sqrt(C), 1/sqrt(C))
    bound = 1.0 / jnp.sqrt(jnp.array(C, jnp.float32))
    weight = jax.random.uniform(kw, (n_condition_classes, C),
                                minval=-bound, maxval=bound, dtype=jnp.float32)
    bias = jax.random.uniform(kb, (n_condition_classes,),
                              minval=-bound, maxval=bound, dtype=jnp.float32)

    # --- Test 1: default tiling (single contiguous full-HW tile).
    N, H, W = 2, 16, 16
    x = jax.random.normal(kx, (N, C, H, W), dtype=jnp.float32)
    out = jax.block_until_ready(condition_head(x, weight, bias))
    ref = x.mean(axis=(2, 3)) @ weight.T + bias
    assert out.shape == (N, n_condition_classes)
    assert jnp.allclose(out, ref, atol=1e-4, rtol=1e-4)

    # --- Test 2: forced spatial tiling with a partial (masked) last HW step
    # (H*W = 300, THW = 128), exercising the multi-step accumulator path.
    N2, H2, W2 = 2, 15, 20
    x2 = jax.random.normal(kx2, (N2, C, H2, W2), dtype=jnp.float32)
    out2 = jax.block_until_ready(condition_head(x2, weight, bias, thw=128))
    ref2 = x2.mean(axis=(2, 3)) @ weight.T + bias
    assert out2.shape == (N2, n_condition_classes)
    assert jnp.allclose(out2, ref2, atol=1e-4, rtol=1e-4)

    # --- Test 3: bf16 input stays bf16 through the DMA; f32 accumulation.
    N3, H3, W3 = 2, 16, 16
    x3 = jax.random.normal(kx3, (N3, C, H3, W3), dtype=jnp.bfloat16)
    out3 = jax.block_until_ready(condition_head(x3, weight, bias))
    ref3 = x3.astype(jnp.float32).mean(axis=(2, 3)) @ weight.T + bias
    assert out3.shape == (N3, n_condition_classes)
    assert jnp.allclose(out3.astype(jnp.float32), ref3, atol=2e-2, rtol=2e-2)

    print("KERNEL_OK")
</pallas_src>

<mosaic_0001>
module attributes {stable_mosaic.version = 11 : i64} {
  func.func @_condition_head_kernel(%arg0: i32, %arg1: i32, %arg2: memref<2x32x256xf32, #tpu.memory_space<vmem>>, %arg3: memref<32x8xf32, #tpu.memory_space<vmem>>, %arg4: memref<1x8xf32, #tpu.memory_space<vmem>>, %arg5: memref<2x8xf32, #tpu.memory_space<vmem>>, %arg6: memref<2x32xf32, #tpu.memory_space<vmem>>) attributes {dimension_semantics = [#tpu.dimension_semantics<parallel>, #tpu.dimension_semantics<arbitrary>], iteration_bounds = array<i64: 1, 1>, scalar_prefetch = 0 : i64, scratch_operands = 1 : i64, tpu.core_type = #tpu.core_type<tc>, window_params = [{transform_indices = @transform_0, window_bounds = array<i64: 2, 32, 256>}, {pipeline_mode = #tpu.pipeline_mode<synchronous>, transform_indices = @transform_1, window_bounds = array<i64: 32, 8>}, {pipeline_mode = #tpu.pipeline_mode<synchronous>, transform_indices = @transform_2, window_bounds = array<i64: 1, 8>}, {transform_indices = @transform_3, window_bounds = array<i64: 2, 8>}]} {
    %c0_i32 = arith.constant 0 : i32
    %0 = arith.cmpi eq, %arg1, %c0_i32 : i32
    %1 = arith.extui %0 : i1 to i32
    %c0_i32_0 = arith.constant 0 : i32
    %2 = arith.cmpi ne, %1, %c0_i32_0 : i32
    scf.if %2 {
      %cst_11 = arith.constant 0.000000e+00 : f32
      %13 = vector.broadcast %cst_11 : f32 to vector<2x32xf32>
      %c0_12 = arith.constant 0 : index
      %c0_13 = arith.constant 0 : index
      %14 = vector.load %arg6[%c0_12, %c0_13] : memref<2x32xf32, #tpu.memory_space<vmem>>, vector<2x32xf32>
      tpu.vector_store %arg6[%c0_12, %c0_13], %13 {strides = array<i32>} : memref<2x32xf32, #tpu.memory_space<vmem>>, vector<2x32xf32>,
    } else {
    }
    %c0 = arith.constant 0 : index
    %c0_1 = arith.constant 0 : index
    %3 = vector.load %arg6[%c0, %c0_1] : memref<2x32xf32, #tpu.memory_space<vmem>>, vector<2x32xf32>
    %c0_2 = arith.constant 0 : index
    %c0_3 = arith.constant 0 : index
    %c0_4 = arith.constant 0 : index
    %4 = vector.load %arg2[%c0_2, %c0_3, %c0_4] : memref<2x32x256xf32, #tpu.memory_space<vmem>>, vector<2x32x128xf32>
    %c0_5 = arith.constant 0 : index
    %c0_6 = arith.constant 0 : index
    %c128 = arith.constant 128 : index
    %5 = vector.load %arg2[%c0_5, %c0_6, %c128] : memref<2x32x256xf32, #tpu.memory_space<vmem>>, vector<2x32x128xf32>
    %6 = arith.addf %4, %5 : vector<2x32x128xf32>
    %cst = arith.constant dense<0.000000e+00> : vector<2x32xf32>
    %7 = vector.multi_reduction <add>, %6, %cst [2] : vector<2x32x128xf32> to vector<2x32xf32>
    %8 = arith.addf %3, %7 : vector<2x32xf32>
    %c0_7 = arith.constant 0 : index
    %c0_8 = arith.constant 0 : index
    %9 = vector.load %arg6[%c0_7, %c0_8] : memref<2x32xf32, #tpu.memory_space<vmem>>, vector<2x32xf32>
    tpu.vector_store %arg6[%c0_7, %c0_8], %8 {strides = array<i32>} : memref<2x32xf32, #tpu.memory_space<vmem>>, vector<2x32xf32>,
    %c0_i32_9 = arith.constant 0 : i32
    %10 = arith.cmpi eq, %arg1, %c0_i32_9 : i32
    %11 = arith.extui %10 : i1 to i32
    %c0_i32_10 = arith.constant 0 : i32
    %12 = arith.cmpi ne, %11, %c0_i32_10 : i32
    scf.if %12 {
      %c0_11 = arith.constant 0 : index
      %c0_12 = arith.constant 0 : index
      %13 = vector.load %arg6[%c0_11, %c0_12] : memref<2x32xf32, #tpu.memory_space<vmem>>, vector<2x32xf32>
      %c0_13 = arith.constant 0 : index
      %c0_14 = arith.constant 0 : index
      %14 = vector.load %arg3[%c0_13, %c0_14] : memref<32x8xf32, #tpu.memory_space<vmem>>, vector<32x8xf32>
      %cst_15 = arith.constant dense<0.000000e+00> : vector<2x8xf32>
      %15 = tpu.matmul %13, %14, %cst_15 {dimension_numbers = #tpu.dot_dimension_numbers<[1], [0], [0], [1], [0, 0, 1, 1], [], []>} : vector<2x32xf32>, vector<32x8xf32>, vector<2x8xf32> -> vector<2x8xf32>
      %c0_16 = arith.constant 0 : index
      %c0_17 = arith.constant 0 : index
      %16 = vector.load %arg4[%c0_16, %c0_17] : memref<1x8xf32, #tpu.memory_space<vmem>>, vector<1x8xf32>
      %17 = vector.broadcast %16 : vector<1x8xf32> to vector<2x8xf32>
      %18 = arith.addf %15, %17 : vector<2x8xf32>
      %c0_18 = arith.constant 0 : index
      %c0_19 = arith.constant 0 : index
      %19 = vector.load %arg5[%c0_18, %c0_19] : memref<2x8xf32, #tpu.memory_space<vmem>>, vector<2x8xf32>
      tpu.vector_store %arg5[%c0_18, %c0_19], %18 {strides = array<i32>} : memref<2x8xf32, #tpu.memory_space<vmem>>, vector<2x8xf32>,
    } else {
    }
    return
  }
  func.func @transform_0(%arg0: i32, %arg1: i32) -> (i32, i32, i32) {
    %c0_i32 = arith.constant 0 : i32
    %c0_i32_0 = arith.constant 0 : i32
    return %arg0, %c0_i32, %arg1 : i32, i32, i32
  }
  func.func @transform_1(%arg0: i32, %arg1: i32) -> (i32, i32) {
    %c0_i32 = arith.constant 0 : i32
    %c0_i32_0 = arith.constant 0 : i32
    %c0_i32_1 = arith.constant 0 : i32
    return %c0_i32, %c0_i32_0 : i32, i32
  }
  func.func @transform_2(%arg0: i32, %arg1: i32) -> (i32, i32) {
    %c0_i32 = arith.constant 0 : i32
    %c0_i32_0 = arith.constant 0 : i32
    %c0_i32_1 = arith.constant 0 : i32
    return %c0_i32, %c0_i32_0 : i32, i32
  }
  func.func @transform_3(%arg0: i32, %arg1: i32) -> (i32, i32) {
    %c0_i32 = arith.constant 0 : i32
    %c0_i32_0 = arith.constant 0 : i32
    return %arg0, %c0_i32 : i32, i32
  }
}

</mosaic_0001>

<bundles_post_ra>
// kernel: tpu_custom_call.1
= control target key start
LH: loop header
LB: loop body
LE: loop exit
PB: predicated region body
PF: predicated region fallthrough
CT: control target
= control target key end

     0   :  { %8 = vsyncpa [#allocation4], 0  ;;  %s359_s0 = inlined_call_operand.hbm [shape: f32[2,32,256], index: 0, kind: input, shape index: {}]   ;;  %s360_s1 = inlined_call_operand.vmem [shape: f32[32,8], index: 1, kind: input, shape index: {}]   ;;  %s361_s2 = inlined_call_operand.vmem [shape: f32[1,8], index: 2, kind: input, shape index: {}]   ;;  %s362_s3 = inlined_call_operand.hbm [shape: f32[2,8], index: 3, kind: output, shape index: {}]  }
   0x1   :  { %9 = vsyncpa [#allocation5], 0  ;;  %s310_s12 = smov [#allocation3]  }
   0x2   :  { %s15_s13 = sshll.u32 %s310_s12, 4  ;;  %s16_s13 = int_to_ptr.vmem [resolvable:$true] %s15_s13 }
   0x3   :  { %s274_s14 = scalar_lea.vmem %s16_s13, 2048  ;;  %p279_p1 = scmp.lt.s32.totalorder %s16_s13, %s16_s13 }
   0x4   :  { %p275_p0 = scmp.ne.s32.totalorder %s16_s13, %s274_s14  ;;  %p280_p2 = scmp.lt.s32.totalorder %s274_s14, %s274_s14 }
   0x6   :  { %p281_p3 = por %p280_p2, %p279_p1 }
   0x8   :  { %p282_p4 = pnand %p281_p3, %p275_p0 }
   0xa   :  { %285 = shalt.err (!%p282_p4)
}
   0xb   :  { %s311_s15 = smov 256   ;;  %s312_s16 = smov 16  }
   0xc   :  { %21 = dma.hbm_to_vmem [thread:$0]  %s359_s0, 2048, %s16_s13, [#allocation4], %s311_s15, %s311_s15, %s312_s16  }
   0xd   :  { %306 = dma.done.wait [#allocation4], 2048  }
   0xe   :  { %307 = vsyncadd [#allocation4], 4294965248  ;;  %v40_v0 = vld [vmem:[#allocation3 + $0x40] sm:$0xff]  ;;  %v48_v1 = vld [vmem:[#allocation3 + $0x48] sm:$0xff]  ;;  %vm33_vm0 = vcmask 254976   ;;  %v313_v24 = vmov 0.0   ;;  %v84_v29 = vlaneseq }
   0xf   :  { %v36_v2 = vld [vmem:[#allocation3] sm:$0xff]  ;;  %v56_v3 = vadd.f32 %v48_v1, %v40_v0  ;;  %v44_v4 = vld [vmem:[#allocation3 + $0x8] sm:$0xff]  ;;  %v41_v5 = vld [vmem:[#allocation3 + $0x50] sm:$0xff]  ;;  %34 = vst.msk [vmem:[#allocation2] sm:$0x3] %vm33_vm0, %v313_v24  ;;  %249 = vmatprep.subr.mxu0 %v313_v24  ;;  %vm314_vm1 = vmmov 0  }
  0x10   :  { %v49_v6 = vld [vmem:[#allocation3 + $0x58] sm:$0xff]  ;;  %v52_v7 = vadd.f32 %v44_v4, %v36_v2  ;;  %v37_v8 = vld [vmem:[#allocation3 + $0x10] sm:$0xff]  ;;  %v42_v12 = vld [vmem:[#allocation3 + $0x60] sm:$0xff]  ;;  %257 = vmatprep.mubr.msk.f32.mxu0 %vm314_vm1, %v313_v24  ;;  %v85_v30 = vand.u32 127, %v84_v29  ;;  %v87_v35 = vshrl.u32 %v84_v29, 7  ;;  %vm95_vm2 = vcmask 130112  }
  0x11   :  { %v45_v9 = vld [vmem:[#allocation3 + $0x18] sm:$0xff]  ;;  %68 = vadd.xlane.f32.xlu1 %v56_v3  ;;  %v57_v10 = vadd.f32 %v49_v6, %v41_v5  ;;  %v50_v13 = vld [vmem:[#allocation3 + $0x68] sm:$0xff]  ;;  %v38_v14 = vld [vmem:[#allocation3 + $0x20] sm:$0xff]  ;;  %vm102_vm3 = vcmask 195712   ;;  %vm109_vm4 = vcmask 261312   ;;  %vm130_vm5 = vcmask 1041409  }
  0x12   :  { %60 = vadd.xlane.f32.xlu0 %v52_v7  ;;  %v53_v11 = vadd.f32 %v45_v9, %v37_v8  ;;  %v46_v15 = vld [vmem:[#allocation3 + $0x28] sm:$0xff]  ;;  %v58_v16 = vadd.f32 %v50_v13, %v42_v12  ;;  %v43_v18 = vld [vmem:[#allocation3 + $0x70] sm:$0xff]  ;;  %v51_v19 = vld [vmem:[#allocation3 + $0x78] sm:$0xff]  ;;  %v90_v33 = vadd.s32 4294967288, %v85_v30  ;;  %v97_v34 = vadd.s32 4294967280, %v85_v30  ;;  %s315_s27 = smov [#allocation6]  }
  0x13   :  { %v54_v17 = vadd.f32 %v46_v15, %v38_v14  ;;  %v39_v20 = vld [vmem:[#allocation3 + $0x30] sm:$0xff]  ;;  %v47_v21 = vld [vmem:[#allocation3 + $0x38] sm:$0xff]  ;;  %v59_v22 = vadd.f32 %v51_v19, %v43_v18  ;;  %v141_v27 = vld [vmem:[%s360_s1 + $0x8] sm:$0xff]  ;;  %v104_v39 = vadd.s32 4294967272, %v85_v30  ;;  %v88_v41 = vsub.s32 %v85_v30, %v87_v35  ;;  %s233_s28 = sshll.u32 %s315_s27, 4  ;;  %s234_s28 = int_to_ptr.vmem [resolvable:$true] %s233_s28 }
  0x14   :  { %v55_v23 = vadd.f32 %v47_v21, %v39_v20  ;;  %v143_v25 = vld [vmem:[%s360_s1 + $0x18] sm:$0xff]  ;;  %v142_v26 = vld [vmem:[%s360_s1 + $0x10] sm:$0xff]  ;;  %v140_v28 = vld [vmem:[%s360_s1] sm:$0xff]  ;;  %v93_v37 = vsub.s32 %v90_v33, %v87_v35  ;;  %v100_v40 = vsub.s32 %v97_v34, %v87_v35  ;;  %vm151_vm6 = vcmask 261120   ;;  %s286_s29 = scalar_lea.vmem %s234_s28, 32  ;;  %p291_p6 = scmp.lt.s32.totalorder %s234_s28, %s234_s28 }
  0x15   :  { %70 = vadd.xlane.f32.xlu1 %v57_v10  ;;  %250 = vmatpush3.msra.mxu0 %v143_v25  ;;  %v107_v45 = vsub.s32 %v104_v39, %v87_v35  ;;  %v242_v1 = vld [vmem:[%s361_s2] ss:$0 sm:$0xff]  ;;  %vm225_vm7 = vcmask 58368   ;;  %p287_p5 = scmp.ne.s32.totalorder %s234_s28, %s286_s29  ;;  %p292_p7 = scmp.lt.s32.totalorder %s286_s29, %s286_s29 }
  0x16   :  { %62 = vadd.xlane.f32.xlu0 %v53_v11  ;;  %251 = vmatprep.subr.mxu0 %v313_v24  ;;  %v35_v60 = vld [vmem:[#allocation2] sm:$0x3] }
  0x17   :  { %252 = vmatpush3.msra.mxu0 %v142_v26  ;;  %p293_p8 = por %p292_p7, %p291_p6 }
  0x18   :  { %253 = vmatprep.subr.mxu0 %v313_v24 }
  0x19   :  { %72 = vadd.xlane.f32.xlu1 %v58_v16  ;;  %254 = vmatpush3.msra.mxu0 %v141_v27  ;;  %p294_p9 = pnand %p293_p8, %p287_p5 }
  0x1a   :  { %64 = vadd.xlane.f32.xlu0 %v54_v17  ;;  %255 = vmatprep.subr.mxu0 %v313_v24 }
  0x1b   :  { %256 = vmatpush3.msra.mxu0 %v140_v28 }
  0x1d   :  { %74 = vadd.xlane.f32.xlu1 %v59_v22 }
  0x1e   :  { %66 = vadd.xlane.f32.xlu0 %v55_v23 }
  0x9a   :  { %v69_v31 = vpop.xlane.xlu1 %68 }
  0x9b   :  { %v61_v32 = vpop.xlane.xlu0 %60  ;;  %v114_v48 = vrot.slane %v69_v31, %v88_v41 }
  0x9c   :  { %v89_v50 = vrot.slane %v61_v32, %v88_v41 }
  0x9e   :  { %v71_v36 = vpop.xlane.xlu1 %70 }
  0x9f   :  { %v63_v38 = vpop.xlane.xlu0 %62  ;;  %v118_v43 = vrot.slane %v71_v36, %v93_v37 }
  0xa0   :  { %v94_v46 = vrot.slane %v63_v38, %v93_v37 }
  0xa1   :  { %v119_v52 = vsel %vm95_vm2, %v118_v43, %v114_v48 }
  0xa2   :  { %v73_v42 = vpop.xlane.xlu1 %72  ;;  %v96_v55 = vsel %vm95_vm2, %v94_v46, %v89_v50 }
  0xa3   :  { %v65_v44 = vpop.xlane.xlu0 %64  ;;  %v123_v47 = vrot.slane %v73_v42, %v100_v40 }
  0xa4   :  { %v101_v49 = vrot.slane %v65_v44, %v100_v40 }
  0xa5   :  { %v124_v56 = vsel %vm102_vm3, %v123_v47, %v119_v52 }
  0xa6   :  { %v75_v51 = vpop.xlane.xlu1 %74  ;;  %v103_v58 = vsel %vm102_vm3, %v101_v49, %v96_v55 }
  0xa7   :  { %v128_v53 = vrot.slane %v75_v51, %v107_v45  ;;  %v67_v54 = vpop.xlane.xlu0 %66 }
  0xa8   :  { %v108_v57 = vrot.slane %v67_v54, %v107_v45 }
  0xa9   :  { %v129_v59 = vsel %vm109_vm4, %v128_v53, %v124_v56 }
  0xaa   :  { %v110_v61 = vsel %vm109_vm4, %v108_v57, %v103_v58 }
  0xab   :  { %v131_v62 = vsel %vm130_vm5, %v129_v59, %v110_v61 }
  0xac   :  { %v133_v63 = vadd.f32 %v131_v62, %v35_v60 }
  0xae   :  { %135 = vst.msk [vmem:[#allocation2] sm:$0x3] %vm33_vm0, %v133_v63 }
  0xb5   :  { %v139_v0 = vld [vmem:[#allocation2] sm:$0x3] }
  0xb6   :  { %258 = vmatmul.mubr.msk.f32.vlgmr.msra.gmra.mxu0 %vm151_vm6, %v139_v0 }
 0x176   :  { %v221_v2 = vpop.f32.mrf.mxu0 }
 0x177   :  { %v222_v3 = vadd.f32 %v242_v1, %v221_v2 }
 0x178   :  { %v259_v4 = vpop.f32.mrf.mxu0 }
 0x179   :  { %226 = vst.msk [vmem:[#allocation6] sm:$0x3] %vm225_vm7, %v222_v3 }
 0x17a   :  { %297 = shalt.err (!%p294_p9)
}
 0x17b   :  { %236 = dma.vmem_to_hbm [thread:$0]  %s234_s28, 32, %s362_s3, [#allocation5]  }
 0x17c   :  { %308 = dma.done.wait [#allocation5], 32  }
 0x17d   :  { %309 = vsyncadd [#allocation5], 4294967264 }
 0x17e   :  { %240 = vsyncpa [#allocation4], 1 }
 0x17f   :  { %241 = vsyncpa [#allocation5], 1 }

</bundles_post_ra>
